<compile_context>
chip_gen: v7x
topology: tpu7x:2x2x1
jax: 0.10.0
libtpu: 0.0.40
codegen_flags: <defaults>
</compile_context>

<pallas_src>
import functools

import jax
import jax.numpy as jnp
from jax.experimental import pallas as pl
from jax.experimental.pallas import tpu as pltpu


def _dse_wd_kernel(means_ref, k_ref, *, inv_total_b):
    """Accumulates the (M, M) Gram matrix K = mean_b exp(-wd2) over B tiles.

    means_ref: (B_TILE, M, A) float32 block (batch-major).
    k_ref:     (M, M) float32 output block, resident across the B grid axis.
    """
    bt = pl.program_id(0)

    @pl.when(bt == 0)
    def _init():
        k_ref[...] = jnp.zeros_like(k_ref)

    x = means_ref[...]                                       # (Bt, M, A) f32
    m = x.shape[1]
    a = x.shape[2]

    # Unbiased (ddof=1) variance over the member axis (== torch.var(dim=0)),
    # two-pass for accuracy, computed directly from the already-loaded block.
    mu = jnp.mean(x, axis=1, keepdims=True)                  # (Bt, 1, A)
    var = jnp.sum(jnp.square(x - mu), axis=1) / (m - 1.0)    # (Bt, A)

    # Fold the 1/2 and the mean over A into a single per-element weight so the
    # A-reduction becomes a plain contraction (exact divide, one sqrt).
    w = 1.0 / ((2.0 * a) * (var + 1e-8))                     # (Bt, A)
    y = x * jnp.sqrt(w)[:, None, :]                          # (Bt, M, A)

    # Sum-of-squares expansion: d[b,i,j] = sq[b,i] + sq[b,j] - 2*G[b,i,j].
    # The contraction over A runs on the MXU; intermediates are O(M^2 * Bt).
    sq = jnp.sum(y * y, axis=-1)                             # (Bt, M)
    g = jnp.einsum('bia,bja->bij', y, y,
                   preferred_element_type=jnp.float32)       # (Bt, M, M)
    d = sq[:, :, None] + sq[:, None, :] - 2.0 * g            # (Bt, M, M)

    # Partial sum over this batch tile; divide by total B in the epilogue.
    k_ref[...] += jnp.sum(jnp.exp(-d), axis=0)               # (M, M)

    @pl.when(bt == pl.num_programs(0) - 1)
    def _finalize():
        k = k_ref[...] * inv_total_b
        # d[i,i] == 0 analytically -> hard-set an exact unit diagonal
        # (matches the broadcast-difference reference; friendlier Cholesky).
        row = jax.lax.broadcasted_iota(jnp.int32, k.shape, 0)
        col = jax.lax.broadcasted_iota(jnp.int32, k.shape, 1)
        k_ref[...] = jnp.where(row == col, 1.0, k)


def _pick_b_tile(b, max_tile=256):
    """Largest divisor of b that is <= max_tile (keeps blocks exact)."""
    for t in range(min(b, max_tile), 0, -1):
        if b % t == 0:
            return t
    return b


def dse_forward(means, beta=1.0, b_tile=None):
    """DSE.forward for kernel='wd', alpha=None, given stacked means (M, B, A)."""
    M, B, A = means.shape
    assert M >= 2, "unbiased variance over ensemble members requires M >= 2"
    if b_tile is None:
        b_tile = _pick_b_tile(B)
    assert B % b_tile == 0, "b_tile must divide B"

    # Batch-major layout so the in-kernel contraction is a standard
    # batch-leading MXU einsum ('bia,bja->bij').  In production the caller
    # would stack the member means directly in this layout.
    means_bma = jnp.transpose(means, (1, 0, 2)).astype(jnp.float32)  # (B, M, A)

    kernel = functools.partial(_dse_wd_kernel, inv_total_b=1.0 / B)

    K = pl.pallas_call(
        kernel,
        grid=(B // b_tile,),
        in_specs=[pl.BlockSpec((b_tile, M, A), lambda b: (b, 0, 0))],
        out_specs=pl.BlockSpec((M, M), lambda b: (0, 0)),
        out_shape=jax.ShapeDtypeStruct((M, M), jnp.float32),
        compiler_params=pltpu.CompilerParams(
            dimension_semantics=("arbitrary",)),  # B-tile axis is a reduction
    )(means_bma)

    K = 0.5 * (K + K.T)  # cheap MxM symmetrization of float noise
    K_ = beta * K + (1.0 - beta) * jnp.eye(M, dtype=K.dtype)
    # TODO(synk): Cholesky / log-det of the tiny MxM Gram matrix stays in
    # jax.numpy (no Pallas linalg primitive); this is negligible glue work.
    L = jnp.linalg.cholesky(K_)
    return 2.0 * jnp.sum(jnp.log(jnp.diag(L)))


def dse_forward_ref(means, beta=1.0):
    """Pure-JAX reference mirroring the PyTorch module (kernel='wd')."""
    M = means.shape[0]
    a = means[:, None]                           # (M, M, B, A) via broadcast
    b = means[None, :]
    d2 = jnp.square(a - b)
    l2 = jnp.var(means, axis=0, ddof=1) + 1e-8   # torch.var is unbiased
    d = (d2 / (2.0 * l2)).mean(-1)               # (M, M, B)
    K = jnp.exp(-d).mean(-1)                     # (M, M)
    K_ = beta * K + (1.0 - beta) * jnp.eye(M, dtype=K.dtype)
    L = jnp.linalg.cholesky(K_)
    return 2.0 * jnp.sum(jnp.log(jnp.diag(L)))


if __name__ == "__main__":
    key = jax.random.PRNGKey(0)
    # M ensemble members, each distribution mean of shape (batch B, action dim A)
    M, B, A = 4, 64, 128
    means = jax.random.normal(key, (M, B, A), dtype=jnp.float32)

    # b_tile=16 -> 4-step grid: exercises the pipelined B-tile accumulation.
    out = dse_forward(means, beta=1.0, b_tile=16)
    out = jax.block_until_ready(out)

    ref = dse_forward_ref(means, beta=1.0)
    assert jnp.allclose(out, ref, rtol=1e-3, atol=1e-4), (out, ref)

    print("KERNEL_OK")
</pallas_src>

<mosaic_0001>
module attributes {stable_mosaic.version = 11 : i64} {
  func.func @_dse_wd_kernel(%arg0: i32, %arg1: memref<16x4x128xf32, #tpu.memory_space<vmem>>, %arg2: memref<4x4xf32, #tpu.memory_space<vmem>>) attributes {dimension_semantics = [#tpu.dimension_semantics<arbitrary>], iteration_bounds = array<i64: 4>, scalar_prefetch = 0 : i64, scratch_operands = 0 : i64, tpu.core_type = #tpu.core_type<tc>, window_params = [{transform_indices = @transform_0, window_bounds = array<i64: 16, 4, 128>}, {pipeline_mode = #tpu.pipeline_mode<synchronous>, transform_indices = @transform_1, window_bounds = array<i64: 4, 4>}]} {
    %c0_i32 = arith.constant 0 : i32
    %0 = arith.cmpi eq, %arg0, %c0_i32 : i32
    %1 = arith.extui %0 : i1 to i32
    %c0_i32_0 = arith.constant 0 : i32
    %2 = arith.cmpi ne, %1, %c0_i32_0 : i32
    scf.if %2 {
      %cst_19 = arith.constant 0.000000e+00 : f32
      %45 = vector.broadcast %cst_19 : f32 to vector<4x4xf32>
      %c0_20 = arith.constant 0 : index
      %c0_21 = arith.constant 0 : index
      %46 = vector.load %arg2[%c0_20, %c0_21] : memref<4x4xf32, #tpu.memory_space<vmem>>, vector<4x4xf32>
      tpu.vector_store %arg2[%c0_20, %c0_21], %45 {strides = array<i32>} : memref<4x4xf32, #tpu.memory_space<vmem>>, vector<4x4xf32>,
    } else {
    }
    %c0 = arith.constant 0 : index
    %c0_1 = arith.constant 0 : index
    %c0_2 = arith.constant 0 : index
    %3 = vector.load %arg1[%c0, %c0_1, %c0_2] : memref<16x4x128xf32, #tpu.memory_space<vmem>>, vector<16x4x128xf32>
    %cst = arith.constant dense<0.000000e+00> : vector<16x128xf32>
    %4 = vector.multi_reduction <add>, %3, %cst [1] : vector<16x4x128xf32> to vector<16x128xf32>
    %5 = vector.shape_cast %4 : vector<16x128xf32> to vector<16x1x128xf32>
    %cst_3 = arith.constant 4.000000e+00 : f32
    %6 = vector.broadcast %cst_3 : f32 to vector<16x1x128xf32>
    %7 = arith.divf %5, %6 : vector<16x1x128xf32>
    %8 = vector.broadcast %7 : vector<16x1x128xf32> to vector<16x4x128xf32>
    %9 = arith.subf %3, %8 : vector<16x4x128xf32>
    %10 = arith.mulf %9, %9 : vector<16x4x128xf32>
    %cst_4 = arith.constant dense<0.000000e+00> : vector<16x128xf32>
    %11 = vector.multi_reduction <add>, %10, %cst_4 [1] : vector<16x4x128xf32> to vector<16x128xf32>
    %cst_5 = arith.constant 3.000000e+00 : f32
    %12 = vector.broadcast %cst_5 : f32 to vector<16x128xf32>
    %13 = arith.divf %11, %12 : vector<16x128xf32>
    %cst_6 = arith.constant 9.99999993E-9 : f32
    %14 = vector.broadcast %cst_6 : f32 to vector<16x128xf32>
    %15 = arith.addf %13, %14 : vector<16x128xf32>
    %cst_7 = arith.constant 2.560000e+02 : f32
    %16 = vector.broadcast %cst_7 : f32 to vector<16x128xf32>
    %17 = arith.mulf %16, %15 : vector<16x128xf32>
    %cst_8 = arith.constant 1.000000e+00 : f32
    %18 = vector.broadcast %cst_8 : f32 to vector<16x128xf32>
    %19 = arith.divf %18, %17 : vector<16x128xf32>
    %20 = math.sqrt %19 : vector<16x128xf32>
    %21 = vector.shape_cast %20 : vector<16x128xf32> to vector<16x1x128xf32>
    %22 = vector.broadcast %21 : vector<16x1x128xf32> to vector<16x4x128xf32>
    %23 = arith.mulf %3, %22 : vector<16x4x128xf32>
    %24 = arith.mulf %23, %23 : vector<16x4x128xf32>
    %cst_9 = arith.constant dense<0.000000e+00> : vector<16x4xf32>
    %25 = vector.multi_reduction <add>, %24, %cst_9 [2] : vector<16x4x128xf32> to vector<16x4xf32>
    "tpu.trace_start"() <{level = 10 : i32, message = "bia,bja->bij"}> : () -> ()
    %cst_10 = arith.constant dense<0.000000e+00> : vector<16x4x4xf32>
    %26 = tpu.matmul %23, %23, %cst_10 {dimension_numbers = #tpu.dot_dimension_numbers<[2], [2], [1], [1], [0, 0, 0, 1, 1, 1], [0], [0]>} : vector<16x4x128xf32>, vector<16x4x128xf32>, vector<16x4x4xf32> -> vector<16x4x4xf32>
    "tpu.trace_stop"() : () -> ()
    %27 = vector.shape_cast %25 : vector<16x4xf32> to vector<16x4x1xf32>
    %28 = vector.shape_cast %25 : vector<16x4xf32> to vector<16x1x4xf32>
    %29 = vector.broadcast %27 : vector<16x4x1xf32> to vector<16x4x4xf32>
    %30 = vector.broadcast %28 : vector<16x1x4xf32> to vector<16x4x4xf32>
    %31 = arith.addf %29, %30 : vector<16x4x4xf32>
    %cst_11 = arith.constant 2.000000e+00 : f32
    %32 = vector.broadcast %cst_11 : f32 to vector<16x4x4xf32>
    %33 = arith.mulf %32, %26 : vector<16x4x4xf32>
    %34 = arith.subf %31, %33 : vector<16x4x4xf32>
    %c0_12 = arith.constant 0 : index
    %c0_13 = arith.constant 0 : index
    %35 = vector.load %arg2[%c0_12, %c0_13] : memref<4x4xf32, #tpu.memory_space<vmem>>, vector<4x4xf32>
    %cst_14 = arith.constant 0.000000e+00 : f32
    %36 = vector.broadcast %cst_14 : f32 to vector<16x4x4xf32>
    %37 = arith.subf %36, %34 : vector<16x4x4xf32>
    %38 = math.exp %37 : vector<16x4x4xf32>
    %cst_15 = arith.constant dense<0.000000e+00> : vector<4x4xf32>
    %39 = vector.multi_reduction <add>, %38, %cst_15 [0] : vector<16x4x4xf32> to vector<4x4xf32>
    %40 = arith.addf %35, %39 : vector<4x4xf32>
    %c0_16 = arith.constant 0 : index
    %c0_17 = arith.constant 0 : index
    %41 = vector.load %arg2[%c0_16, %c0_17] : memref<4x4xf32, #tpu.memory_space<vmem>>, vector<4x4xf32>
    tpu.vector_store %arg2[%c0_16, %c0_17], %40 {strides = array<i32>} : memref<4x4xf32, #tpu.memory_space<vmem>>, vector<4x4xf32>,
    %c3_i32 = arith.constant 3 : i32
    %42 = arith.cmpi eq, %arg0, %c3_i32 : i32
    %43 = arith.extui %42 : i1 to i32
    %c0_i32_18 = arith.constant 0 : i32
    %44 = arith.cmpi ne, %43, %c0_i32_18 : i32
    scf.if %44 {
      %c0_19 = arith.constant 0 : index
      %c0_20 = arith.constant 0 : index
      %45 = vector.load %arg2[%c0_19, %c0_20] : memref<4x4xf32, #tpu.memory_space<vmem>>, vector<4x4xf32>
      %cst_21 = arith.constant 1.562500e-02 : f32
      %46 = vector.broadcast %cst_21 : f32 to vector<4x4xf32>
      %47 = arith.mulf %45, %46 : vector<4x4xf32>
      %48 = tpu.iota {dimensions = array<i32: 0>} : vector<4x4xi32>
      %49 = tpu.iota {dimensions = array<i32: 1>} : vector<4x4xi32>
      %50 = arith.cmpi eq, %48, %49 : vector<4x4xi32>
      %cst_22 = arith.constant 1.000000e+00 : f32
      %51 = vector.broadcast %cst_22 : f32 to vector<4x4xf32>
      %52 = arith.select %50, %51, %47 : vector<4x4xi1>, vector<4x4xf32>
      %c0_23 = arith.constant 0 : index
      %c0_24 = arith.constant 0 : index
      %53 = vector.load %arg2[%c0_23, %c0_24] : memref<4x4xf32, #tpu.memory_space<vmem>>, vector<4x4xf32>
      tpu.vector_store %arg2[%c0_23, %c0_24], %52 {strides = array<i32>} : memref<4x4xf32, #tpu.memory_space<vmem>>, vector<4x4xf32>,
    } else {
    }
    return
  }
  func.func @transform_0(%arg0: i32) -> (i32, i32, i32) {
    %c0_i32 = arith.constant 0 : i32
    %c0_i32_0 = arith.constant 0 : i32
    %c0_i32_1 = arith.constant 0 : i32
    return %arg0, %c0_i32, %c0_i32_0 : i32, i32, i32
  }
  func.func @transform_1(%arg0: i32) -> (i32, i32) {
    %c0_i32 = arith.constant 0 : i32
    %c0_i32_0 = arith.constant 0 : i32
    %c0_i32_1 = arith.constant 0 : i32
    return %c0_i32, %c0_i32_0 : i32, i32
  }
}

</mosaic_0001>

<bundles_post_ra>
// kernel: tpu_custom_call.1
= control target key start
LH: loop header
LB: loop body
LE: loop exit
PB: predicated region body
PF: predicated region fallthrough
CT: control target
= control target key end

     0   :  { %6 = vsyncpa [#allocation3], 0  ;;  %s3082_s0 = inlined_call_operand.hbm [shape: f32[64,4,128], index: 0, kind: input, shape index: {}]   ;;  %s3083_s1 = inlined_call_operand.hbm [shape: f32[4,4], index: 1, kind: output, shape index: {}]  }
   0x1   :  { %8 = vsyncpa [#allocation3 + $0x1], 0 }
   0x2   :  { %9 = vsyncpa [#allocation4], 0  ;;  %s2531_s6 = smov 0   ;;  %s2533_s7 = smov 0  }
   0x3   :  { %s2535_s8 = smov 0   ;;  %s2537_s9 = smov 0  }
   0x4 LB: > { %s2550_s10 = sadd.s32 4294967295, %s2512_s9   ;;  %s2553_s11 = sadd.s32 1, %s2512_s9   ;;  %s2512_s9 = sphi %s2537_s9, %s3090_s9   ;;  %s2508_s8 = sphi %s2535_s8, %s3089_s8   ;;  %s2504_s7 = sphi %s2533_s7, %s3088_s7   ;;  %s2500_s6 = sphi %s2531_s6, %s3087_s6  }
   0x5   : > { %s19_s12 = ssub.s32 %s2512_s9, %s2553_s11  ;;  %s22_s13 = sadd.s32 1, %s2508_s8 }
   0x6   : > { %p20_p0 = scmp.eq.s32.totalorder %s19_s12, 0  ;;  %p29_p1 = scmp.ne.s32.totalorder %s2508_s8, %s2504_s7 }
   0x7   : > { %p30_p2 = scmp.eq.s32.totalorder %s2512_s9, 0  ;;  %p35_p3 = scmp.ne.s32.totalorder %s2504_s7, %s2500_s6 }
   0x8   : > { %s2563_s14 = scalar_select %p20_p0, %s2508_s8, %s22_s13  }
   0x9   : > { %p31_p4 = por %p30_p2, %p29_p1  ;;  %p36_p5 = scmp.eq.s32.totalorder %s2550_s10, 0 }
   0xa   : > { %p2281_p6 = scmp.lt.s32.totalorder %s2512_s9, 4  ;;  %s80_s16 = sand.u32 1, %s2508_s8  }
   0xb   : > { %p2567_p7 = por %p36_p5, %p35_p3  ;;  %s2147_s17 = sshll.u32 %s80_s16, 6 }
   0xc   : > { %s2158_s18 = sshll.u32 %s2512_s9, 10  ;;  %s84_s22 = scalar_lea.vmem [#allocation2], %s2147_s17 }
   0xd   : > { %s2576_s21 = scalar_lea.hbm %s3082_s0, %s2158_s18  ;;  %s91_s23 = sshll.u32 %s84_s22, 4  ;;  %s2578_s23 = int_to_ptr.vmem [resolvable:$true] %s91_s23 }
   0xe   : > { %p2580_p8 = pnand %p2281_p6, %p31_p4  ;;  %s2585_s25 = scalar_lea.sflag [#allocation3], %s80_s16 }
   0xf   : > { %s2418_s26 = scalar_lea.hbm %s2576_s21, 1024  ;;  %s2423_s29 = scalar_lea.hbm %s3082_s0, 4096 }
  0x10   : > { %p2419_p10 = scmp.ne.s32.totalorder %s2576_s21, %s2418_s26  ;;  %p2420_p11 = pneg %p2580_p8 }
  0x11   : > { %p2424_p0 = scmp.lt.u32.totalorder %s2576_s21, %s3082_s0  ;;  %p2425_p1 = scmp.lt.u32.totalorder %s2423_s29, %s2418_s26 }
  0x12   : > { %p2421_p12 = pnand %p2420_p11, %p2419_p10  ;;  %p2427_p3 = scmp.lt.u32.totalorder %s2418_s26, %s2576_s21 }
  0x13   : > { %p2426_p2 = por %p2425_p1, %p2424_p0 }
  0x14   : > { %p2422_p13 = pneg %p2421_p12 }
  0x15   : > { %p2428_p4 = por %p2427_p3, %p2426_p2 }
  0x17   : > { %p2429_p5 = pnand %p2428_p4, %p2422_p13 }
  0x19   : > { %2432 = shalt.err (!%p2429_p5)
}
  0x1a   : > { %s2433_s3 = scalar_lea.vmem %s2578_s23, 1024  ;;  %s2514_s4 = smov [#allocation2]  }
  0x1b   : > { %p2434_p6 = scmp.ne.s32.totalorder %s2578_s23, %s2433_s3  ;;  %s2438_s5 = sshll.u32 %s2514_s4, 4  ;;  %s2439_s5 = int_to_ptr.vmem [resolvable:$false] %s2438_s5 }
  0x1c   : > { %s2440_s6 = scalar_lea.vmem %s2439_s5, 2048  ;;  %p2441_p9 = scmp.lt.s32.totalorder %s2578_s23, %s2439_s5 }
  0x1d   : > { %p2436_p10 = pnand %p2434_p6, %p2420_p11  ;;  %p2442_p0 = scmp.lt.s32.totalorder %s2440_s6, %s2433_s3 }
  0x1f   : > { %p2437_p12 = pneg %p2436_p10  ;;  %p2443_p1 = por %p2442_p0, %p2441_p9 }
  0x21   : > { %p2444_p2 = pnand %p2443_p1, %p2437_p12 }
  0x23   : > { %2447 = shalt.err (!%p2444_p2)
}
  0x24   : > { %s2515_s12 = smov 64   ;;  %s2516_s13 = smov 4  }
  0x25   : > { %2280 = dma.hbm_to_vmem [thread:$0]  (!%p2580_p8), %s2576_s21, 1024, %s2578_s23, %s2585_s25, %s2515_s12, %s2515_s12, %s2516_s13  }
  0x26   : > { %p99_p11 = scmp.lt.s32.totalorder %s2512_s9, 5  ;;  %p3086_p13 = scmp.ge.s32.totalorder %s2512_s9, 1 }
  0x28   : > { %p100_p3 = pnand %p3086_p13, %p99_p11 }
  0x29   : > { %s105_s16 = sand.u32 (!%p100_p3), 1, %s2504_s7  }
  0x2a   : > { %103 = sbr.rel (%p100_p3) target bundleno = 482 (0x1e2), region = 24  ;;  %s2151_s17 = sshll.u32 (!%p100_p3), %s105_s16, 6 }
  0x2b   : > { %s106_s18 = scalar_lea.sflag (!%p100_p3), [#allocation3], %s105_s16  ;;  %s2617_s19 = scalar_lea.vmem (!%p100_p3), [#allocation2], %s2151_s17 }
  0x31   : > { %2491 = dma.done.wait (%p2567_p7), %s106_s18, 1024  }
  0x32   : > { %2493 = vsyncadd (%p2567_p7), %s106_s18, 4294966272  ;;  %p2152_p9 = scmp.ne.s32.totalorder %s2550_s10, 0 }
  0x33   : > { %vm128_vm0 = vcmask (!%p2152_p9), 27648   ;;  %v2517_v0 = vmov (!%p2152_p9), 0.0  }
  0x34   : > { %127 = sbr.rel (%p2152_p9) target bundleno = 59 (0x3b), region = 32  ;;  %129 = vst.msk [vmem:[#allocation5] sm:$0xf] (!%p2152_p9), %vm128_vm0, %v2517_v0 }
  0x3b PF: > { %v2625_v1 = vld [vmem:[%s2617_s19] sm:$0xf]  ;;  %vm146_vm1 = vcmask 1043456   ;;  %v2628_v2 = vld [vmem:[%s2617_s19 + $0x4] sm:$0xf]  ;;  %v2518_v3 = vmov 0.0  }
  0x3c   : > { %2191 = vmatprep.subr.mxu0 %v2518_v3  ;;  %2196 = vmatprep.subr.mxu1 %v2518_v3  ;;  %v147_v4 = vsel %vm146_vm1, %v2625_v1, 0.0  ;;  %v154_v5 = vsel %vm146_vm1, %v2628_v2, 0.0  ;;  %v2637_v6 = vld [vmem:[%s2617_s19 + $0x8] sm:$0xf]  ;;  %vm2519_vm2 = vmmov 0   ;;  %p2153_p7 = scmp.ne.s32.totalorder %s2550_s10, 3 }
  0x3d   : > { %v148_v7 = vrot.slane %v147_v4, 4  ;;  %v155_v8 = vrot.slane %v154_v5, 4  ;;  %2193 = vmatprep.mubr.msk.f32.mxu0 %vm2519_vm2, %v2518_v3  ;;  %2198 = vmatprep.mubr.msk.f32.mxu1 %vm2519_vm2, %v2518_v3  ;;  %v161_v9 = vsel %vm146_vm1, %v2637_v6, 0.0  ;;  %v2646_v10 = vld [vmem:[%s2617_s19 + $0xc] sm:$0xf] }
  0x3e   : > { %v162_v11 = vrot.slane %v161_v9, 4  ;;  %v168_v12 = vsel %vm146_vm1, %v2646_v10, 0.0  ;;  %v2651_v13 = vld [vmem:[%s2617_s19 + $0x10] sm:$0xf]  ;;  %v2654_v14 = vld [vmem:[%s2617_s19 + $0x14] sm:$0xf] }
  0x3f   : > { %v149_v15 = vadd.f32 %v148_v7, %v147_v4  ;;  %v156_v16 = vadd.f32 %v155_v8, %v154_v5  ;;  %v169_v17 = vrot.slane %v168_v12, 4  ;;  %v175_v18 = vsel %vm146_vm1, %v2651_v13, 0.0  ;;  %v2659_v19 = vld [vmem:[%s2617_s19 + $0x18] sm:$0xf]  ;;  %v2662_v20 = vld [vmem:[%s2617_s19 + $0x1c] sm:$0xf] }
  0x40   : > { %v163_v21 = vadd.f32 %v162_v11, %v161_v9  ;;  %v176_v22 = vrot.slane %v175_v18, 4  ;;  %v182_v23 = vsel %vm146_vm1, %v2654_v14, 0.0  ;;  %v189_v24 = vsel %vm146_vm1, %v2659_v19, 0.0 }
  0x41   : > { %v150_v25 = vrot.slane %v149_v15, 2  ;;  %v157_v26 = vrot.slane %v156_v16, 2  ;;  %v170_v27 = vadd.f32 %v169_v17, %v168_v12  ;;  %v183_v28 = vrot.slane %v182_v23, 4 }
  0x42   : > { %v164_v29 = vrot.slane %v163_v21, 2  ;;  %v177_v30 = vadd.f32 %v176_v22, %v175_v18  ;;  %v190_v31 = vrot.slane %v189_v24, 4  ;;  %v196_v32 = vsel %vm146_vm1, %v2662_v20, 0.0 }
  0x43   : > { %v151_v33 = vadd.f32 %v150_v25, %v149_v15  ;;  %v158_v34 = vadd.f32 %v157_v26, %v156_v16  ;;  %v171_v35 = vrot.slane %v170_v27, 2  ;;  %v184_v36 = vadd.f32 %v183_v28, %v182_v23 }
  0x44   : > { %v165_v37 = vadd.f32 %v164_v29, %v163_v21  ;;  %v178_v38 = vrot.slane %v177_v30, 2  ;;  %v191_v39 = vadd.f32 %v190_v31, %v189_v24  ;;  %v197_v40 = vrot.slane %v196_v32, 4 }
  0x45   : > { %v152_v41 = vrot.slane %v151_v33, 1  ;;  %v159_v42 = vrot.slane %v158_v34, 1  ;;  %v172_v43 = vadd.f32 %v171_v35, %v170_v27  ;;  %v185_v44 = vrot.slane %v184_v36, 2 }
  0x46   : > { %v166_v45 = vrot.slane %v165_v37, 1  ;;  %v179_v46 = vadd.f32 %v178_v38, %v177_v30  ;;  %v192_v47 = vrot.slane %v191_v39, 2  ;;  %v198_v48 = vadd.f32 %v197_v40, %v196_v32 }
  0x47   : > { %v153_v49 = vadd.f32 %v152_v41, %v151_v33  ;;  %v160_v50 = vadd.f32 %v159_v42, %v158_v34  ;;  %v173_v51 = vrot.slane %v172_v43, 1  ;;  %v186_v52 = vadd.f32 %v185_v44, %v184_v36 }
  0x48   : > { %v167_v53 = vadd.f32 %v166_v45, %v165_v37  ;;  %v180_v54 = vrot.slane %v179_v46, 1  ;;  %v193_v55 = vadd.f32 %v192_v47, %v191_v39  ;;  %v199_v56 = vrot.slane %v198_v48, 2 }
  0x49   : > { %v260_v57 = vmul.f32 0.25, %v153_v49  ;;  %v261_v58 = vmul.f32 0.25, %v160_v50  ;;  %v174_v59 = vadd.f32 %v173_v51, %v172_v43  ;;  %v187_v60 = vrot.slane %v186_v52, 1 }
  0x4a   : > { %v262_v61 = vmul.f32 0.25, %v167_v53  ;;  %v181_v62 = vadd.f32 %v180_v54, %v179_v46  ;;  %v194_v63 = vrot.slane %v193_v55, 1  ;;  %v200_v0 = vadd.f32 %v199_v56, %v198_v48 }
  0x4b   : > { %v276_v4 = vsub.f32 %v2625_v1, %v260_v57  ;;  %v277_v5 = vsub.f32 %v2628_v2, %v261_v58  ;;  %v263_v7 = vmul.f32 0.25, %v174_v59  ;;  %v188_v8 = vadd.f32 %v187_v60, %v186_v52 }
  0x4c   : > { %v278_v9 = vsub.f32 %v2637_v6, %v262_v61  ;;  %v264_v11 = vmul.f32 0.25, %v181_v62  ;;  %v195_v12 = vadd.f32 %v194_v63, %v193_v55  ;;  %v201_v15 = vrot.slane %v200_v0, 1 }
  0x4d   : > { %v292_v16 = vmul.f32 %v276_v4, %v276_v4  ;;  %v293_v17 = vmul.f32 %v277_v5, %v277_v5  ;;  %v279_v18 = vsub.f32 %v2646_v10, %v263_v7  ;;  %v265_v21 = vmul.f32 0.25, %v188_v8 }
  0x4e   : > { %v294_v22 = vmul.f32 %v278_v9, %v278_v9  ;;  %v280_v23 = vsub.f32 %v2651_v13, %v264_v11  ;;  %v266_v24 = vmul.f32 0.25, %v195_v12  ;;  %v202_v25 = vadd.f32 %v201_v15, %v200_v0 }
  0x4f   : > { %v308_v26 = vsel %vm146_vm1, %v292_v16, 0.0  ;;  %v315_v27 = vsel %vm146_vm1, %v293_v17, 0.0  ;;  %v295_v28 = vmul.f32 %v279_v18, %v279_v18  ;;  %v281_v29 = vsub.f32 %v2654_v14, %v265_v21 }
  0x50   : > { %v309_v30 = vrot.slane %v308_v26, 4  ;;  %v316_v31 = vrot.slane %v315_v27, 4  ;;  %v322_v32 = vsel %vm146_vm1, %v294_v22, 0.0  ;;  %v296_v33 = vmul.f32 %v280_v23, %v280_v23 }
  0x51   : > { %v323_v34 = vrot.slane %v322_v32, 4  ;;  %v329_v35 = vsel %vm146_vm1, %v295_v28, 0.0  ;;  %v297_v36 = vmul.f32 %v281_v29, %v281_v29  ;;  %v282_v37 = vsub.f32 %v2659_v19, %v266_v24 }
  0x52   : > { %v310_v38 = vadd.f32 %v309_v30, %v308_v26  ;;  %v317_v39 = vadd.f32 %v316_v31, %v315_v27  ;;  %v330_v40 = vrot.slane %v329_v35, 4  ;;  %v336_v41 = vsel %vm146_vm1, %v296_v33, 0.0  ;;  %v2687_v31 = vld [vmem:[%s2617_s19 + $0x20] sm:$0xf] }
  0x53   : > { %v324_v42 = vadd.f32 %v323_v34, %v322_v32  ;;  %v337_v43 = vrot.slane %v336_v41, 4  ;;  %v343_v44 = vsel %vm146_vm1, %v297_v36, 0.0  ;;  %v298_v45 = vmul.f32 %v282_v37, %v282_v37 }
  0x54   : > { %v311_v46 = vrot.slane %v310_v38, 2  ;;  %v318_v47 = vrot.slane %v317_v39, 2  ;;  %v331_v48 = vadd.f32 %v330_v40, %v329_v35  ;;  %v344_v49 = vrot.slane %v343_v44, 4 }
  0x55   : > { %v325_v50 = vrot.slane %v324_v42, 2  ;;  %v338_v51 = vadd.f32 %v337_v43, %v336_v41  ;;  %v350_v52 = vsel %vm146_vm1, %v298_v45, 0.0  ;;  %v267_v53 = vmul.f32 0.25, %v202_v25 }
  0x56   : > { %v312_v54 = vadd.f32 %v311_v46, %v310_v38  ;;  %v319_v55 = vadd.f32 %v318_v47, %v317_v39  ;;  %v332_v56 = vrot.slane %v331_v48, 2  ;;  %v345_v57 = vadd.f32 %v344_v49, %v343_v44 }
  0x57   : > { %v326_v58 = vadd.f32 %v325_v50, %v324_v42  ;;  %v339_v59 = vrot.slane %v338_v51, 2  ;;  %v351_v60 = vrot.slane %v350_v52, 4  ;;  %v283_v61 = vsub.f32 %v2662_v20, %v267_v53 }
  0x58   : > { %v313_v62 = vrot.slane %v312_v54, 1  ;;  %v320_v63 = vrot.slane %v319_v55, 1  ;;  %v333_v0 = vadd.f32 %v332_v56, %v331_v48  ;;  %v346_v4 = vrot.slane %v345_v57, 2  ;;  %v2690_v48 = vld [vmem:[%s2617_s19 + $0x24] sm:$0xf] }
  0x59   : > { %v327_v5 = vrot.slane %v326_v58, 1  ;;  %v340_v7 = vadd.f32 %v339_v59, %v338_v51  ;;  %v352_v8 = vadd.f32 %v351_v60, %v350_v52  ;;  %v299_v9 = vmul.f32 %v283_v61, %v283_v61  ;;  %v2695_v52 = vld [vmem:[%s2617_s19 + $0x28] sm:$0xf]  ;;  %v2698_v56 = vld [vmem:[%s2617_s19 + $0x2c] sm:$0xf] }
  0x5a   : > { %v314_v11 = vadd.f32 %v313_v62, %v312_v54  ;;  %v321_v12 = vadd.f32 %v320_v63, %v319_v55  ;;  %v334_v15 = vrot.slane %v333_v0, 1  ;;  %v347_v16 = vadd.f32 %v346_v4, %v345_v57  ;;  %v2703_v63 = vld [vmem:[%s2617_s19 + $0x30] sm:$0xf] }
  0x5b   : > { %v328_v17 = vadd.f32 %v327_v5, %v326_v58  ;;  %v341_v18 = vrot.slane %v340_v7, 1  ;;  %v353_v21 = vrot.slane %v352_v8, 2  ;;  %v357_v22 = vsel %vm146_vm1, %v299_v9, 0.0 }
  0x5c   : > { %v421_v23 = vmul.f32 0.33333334, %v314_v11  ;;  %v422_v24 = vmul.f32 0.33333334, %v321_v12  ;;  %v335_v25 = vadd.f32 %v334_v15, %v333_v0  ;;  %v348_v26 = vrot.slane %v347_v16, 1 }
  0x5d   : > { %v423_v27 = vmul.f32 0.33333334, %v328_v17  ;;  %v342_v28 = vadd.f32 %v341_v18, %v340_v7  ;;  %v354_v29 = vadd.f32 %v353_v21, %v352_v8  ;;  %v358_v30 = vrot.slane %v357_v22, 4  ;;  %v2712_v17 = vld [vmem:[%s2617_s19 + $0x34] sm:$0xf] }
  0x5e   : > { %v437_v32 = vadd.f32 1e-08, %v421_v23  ;;  %v438_v33 = vadd.f32 1e-08, %v422_v24  ;;  %v424_v34 = vmul.f32 0.33333334, %v335_v25  ;;  %v349_v35 = vadd.f32 %v348_v26, %v347_v16 }
  0x5f   : > { %v439_v36 = vadd.f32 1e-08, %v423_v27  ;;  %v425_v37 = vmul.f32 0.33333334, %v342_v28  ;;  %v355_v38 = vrot.slane %v354_v29, 1  ;;  %v359_v39 = vadd.f32 %v358_v30, %v357_v22 }
  0x60   : > { %v453_v40 = vmul.f32 256.0, %v437_v32  ;;  %v454_v41 = vmul.f32 256.0, %v438_v33  ;;  %v440_v42 = vadd.f32 1e-08, %v424_v34  ;;  %v426_v43 = vmul.f32 0.33333334, %v349_v35 }
  0x61   : > { %v455_v44 = vmul.f32 256.0, %v439_v36  ;;  %v441_v45 = vadd.f32 1e-08, %v425_v37  ;;  %v356_v46 = vadd.f32 %v355_v38, %v354_v29  ;;  %v360_v47 = vrot.slane %v359_v39, 2  ;;  %v2721_v28 = vld [vmem:[%s2617_s19 + $0x38] sm:$0xf] }
  0x62   : > { %2322 = vrcp.f32 %v453_v40  ;;  %v456_v49 = vmul.f32 256.0, %v440_v42  ;;  %v442_v50 = vadd.f32 1e-08, %v426_v43  ;;  %v203_v51 = vsel %vm146_vm1, %v2687_v31, 0.0 }
  0x63   : > { %2324 = vrcp.f32 %v454_v41  ;;  %v457_v53 = vmul.f32 256.0, %v441_v45  ;;  %v427_v54 = vmul.f32 0.33333334, %v356_v46  ;;  %v361_v55 = vadd.f32 %v360_v47, %v359_v39 }
  0x64   : > { %2326 = vrcp.f32 %v455_v44  ;;  %v458_v57 = vmul.f32 256.0, %v442_v50  ;;  %v204_v58 = vrot.slane %v203_v51, 4  ;;  %v210_v59 = vsel %vm146_vm1, %v2690_v48, 0.0 }
  0x65   : > { %2328 = vrcp.f32 %v456_v49  ;;  %v443_v60 = vadd.f32 1e-08, %v427_v54  ;;  %v362_v61 = vrot.slane %v361_v55, 1  ;;  %v211_v62 = vrot.slane %v210_v59, 4 }
  0x66   : > { %2330 = vrcp.f32 %v457_v53  ;;  %v205_v0 = vadd.f32 %v204_v58, %v203_v51  ;;  %v217_v4 = vsel %vm146_vm1, %v2695_v52, 0.0  ;;  %v224_v5 = vsel %vm146_vm1, %v2698_v56, 0.0 }
  0x67   : > { %2332 = vrcp.f32 %v458_v57  ;;  %v459_v7 = vmul.f32 256.0, %v443_v60  ;;  %v363_v8 = vadd.f32 %v362_v61, %v361_v55  ;;  %v212_v9 = vadd.f32 %v211_v62, %v210_v59  ;;  %v2764_v59 = vld [vmem:[%s2617_s19 + $0x3c] sm:$0xf] }
  0x68   : > { %v206_v11 = vrot.slane %v205_v0, 2  ;;  %v218_v12 = vrot.slane %v217_v4, 4  ;;  %v225_v15 = vrot.slane %v224_v5, 4  ;;  %v231_v16 = vsel %vm146_vm1, %v2703_v63, 0.0 }
  0x69   : > { %2334 = vrcp.f32 %v459_v7  ;;  %v428_v18 = vmul.f32 0.33333334, %v363_v8  ;;  %v213_v21 = vrot.slane %v212_v9, 2  ;;  %v232_v22 = vrot.slane %v231_v16, 4 }
  0x6a   : > { %v207_v23 = vadd.f32 %v206_v11, %v205_v0  ;;  %v219_v24 = vadd.f32 %v218_v12, %v217_v4  ;;  %v226_v25 = vadd.f32 %v225_v15, %v224_v5  ;;  %v2716_v26 = vsel %vm146_vm1, %v2712_v17, 0.0 }
  0x6b   : > { %v444_v30 = vadd.f32 1e-08, %v428_v18  ;;  %v214_v32 = vadd.f32 %v213_v21, %v212_v9  ;;  %v233_v33 = vadd.f32 %v232_v22, %v231_v16  ;;  %v239_v37 = vrot.slane %v2716_v26, 4 }
  0x6c   : > { %v2718_v27 = vpop.eup %2322  ;;  %v208_v35 = vrot.slane %v207_v23, 1  ;;  %v220_v36 = vrot.slane %v219_v24, 2  ;;  %v227_v39 = vrot.slane %v226_v25, 2  ;;  %v2736_v40 = vsel %vm146_vm1, %v2721_v28, 0.0 }
  0x6d   : > { %v2723_v29 = vpop.eup %2324  ;;  %2336 = vrsqrt.f32 %v2718_v27  ;;  %vm503_vm3 = vcmp.eq.f32.partialorder %v2718_v27, inf  ;;  %vm505_vm4 = vcmp.eq.f32.partialorder %v2718_v27, 0.0  ;;  %v506_v42 = vand.u32 2147483648, %v2718_v27 }
  0x6e   : > { %v2726_v34 = vpop.eup %2326  ;;  %2338 = vrsqrt.f32 %v2723_v29  ;;  %vm510_vm5 = vcmp.eq.f32.partialorder %v2723_v29, inf  ;;  %vm512_vm6 = vcmp.eq.f32.partialorder %v2723_v29, 0.0  ;;  %v513_v44 = vand.u32 2147483648, %v2723_v29 }
  0x6f   : > { %v2730_v38 = vpop.eup %2328  ;;  %2340 = vrsqrt.f32 %v2726_v34  ;;  %vm517_vm7 = vcmp.eq.f32.partialorder %v2726_v34, inf  ;;  %vm519_vm8 = vcmp.eq.f32.partialorder %v2726_v34, 0.0  ;;  %v520_v45 = vand.u32 2147483648, %v2726_v34 }
  0x70   : > { %v2738_v41 = vpop.eup %2330  ;;  %2342 = vrsqrt.f32 %v2730_v38  ;;  %vm524_vm9 = vcmp.eq.f32.partialorder %v2730_v38, inf  ;;  %v527_v46 = vand.u32 2147483648, %v2730_v38  ;;  %vm526_vm10 = vcmp.eq.f32.partialorder %v2730_v38, 0.0 }
  0x71   : > { %v2744_v43 = vpop.eup %2332  ;;  %2344 = vrsqrt.f32 %v2738_v41  ;;  %vm531_vm11 = vcmp.eq.f32.partialorder %v2738_v41, inf  ;;  %v460_v49 = vmul.f32 256.0, %v444_v30  ;;  %v209_v50 = vadd.f32 %v208_v35, %v207_v23 }
  0x72   : > { %2346 = vrsqrt.f32 %v2744_v43  ;;  %v215_v51 = vrot.slane %v214_v32, 1  ;;  %v221_v53 = vadd.f32 %v220_v36, %v219_v24  ;;  %vm533_vm12 = vcmp.eq.f32.partialorder %v2738_v41, 0.0 }
  0x73   : > { %v2755_v47 = vpop.eup %2334  ;;  %v534_v54 = vand.u32 2147483648, %v2738_v41  ;;  %vm538_vm13 = vcmp.eq.f32.partialorder %v2744_v43, inf  ;;  %v268_v55 = vmul.f32 0.25, %v209_v50  ;;  %vm540_vm14 = vcmp.eq.f32.partialorder %v2744_v43, 0.0 }
  0x74   : > { %2348 = vrsqrt.f32 %v2755_v47  ;;  %v216_v57 = vadd.f32 %v215_v51, %v214_v32  ;;  %v222_v58 = vrot.slane %v221_v53, 1  ;;  %v541_v60 = vand.u32 2147483648, %v2744_v43 }
  0x75   : > { %2350 = vrcp.f32 %v460_v49  ;;  %v228_v61 = vadd.f32 %v227_v39, %v226_v25  ;;  %v234_v62 = vrot.slane %v233_v33, 2  ;;  %vm545_vm15 = vcmp.eq.f32.partialorder %v2755_v47, inf }
  0x76   : > { %v548_v4 = vand.u32 2147483648, %v2755_v47  ;;  %v284_v5 = vsub.f32 %v2687_v31, %v268_v55  ;;  %v269_v7 = vmul.f32 0.25, %v216_v57  ;;  %v223_v8 = vadd.f32 %v222_v58, %v221_v53 }
  0x77   : > { %v2337_v0 = vpop.eup %2336  ;;  %vm547_vm0 = vcmp.eq.f32.partialorder %v2755_v47, 0.0  ;;  %v229_v12 = vrot.slane %v228_v61, 1  ;;  %v2774_v15 = vadd.f32 %v239_v37, %v2716_v26  ;;  %v2778_v16 = vsel %vm146_vm1, %v2764_v59, 0.0 }
  0x78   : > { %v2339_v9 = vpop.eup %2338  ;;  %v502_v11 = vmul.f32 %v2337_v0, %v2718_v27  ;;  %v300_v22 = vmul.f32 %v284_v5, %v284_v5  ;;  %v285_v23 = vsub.f32 %v2690_v48, %v269_v7  ;;  %v235_v24 = vadd.f32 %v234_v62, %v233_v33 }
  0x79   : > { %v2341_v18 = vpop.eup %2340  ;;  %v509_v21 = vmul.f32 %v2339_v9, %v2723_v29  ;;  %v270_v26 = vmul.f32 0.25, %v223_v8  ;;  %v230_v35 = vadd.f32 %v229_v12, %v228_v61  ;;  %v246_v8 = vrot.slane %v2736_v40, 4 }
  0x7a   : > { %v2343_v25 = vpop.eup %2342  ;;  %v504_v30 = vsel %vm503_vm3, %v2718_v27, %v502_v11  ;;  %v516_v32 = vmul.f32 %v2341_v18, %v2726_v34  ;;  %v364_v33 = vsel %vm146_vm1, %v300_v22, 0.0  ;;  %v236_v7 = vrot.slane %v235_v24, 1 }
  0x7b   : > { %v2345_v36 = vpop.eup %2344  ;;  %v507_v37 = vsel %vm505_vm4, %v506_v42, %v504_v30  ;;  %v511_v39 = vsel %vm510_vm5, %v2723_v29, %v509_v21  ;;  %v523_v49 = vmul.f32 %v2343_v25, %v2730_v38  ;;  %v253_v9 = vrot.slane %v2778_v16, 4 }
  0x7c   : > { %v2347_v50 = vpop.eup %2346  ;;  %v2794_v51 = vmul.f32 %v507_v37, %v2625_v1  ;;  %v514_v53 = vsel %vm512_vm6, %v513_v44, %v511_v39  ;;  %v518_v27 = vsel %vm517_vm7, %v2726_v34, %v516_v32  ;;  %v530_v42 = vmul.f32 %v2345_v36, %v2738_v41 }
  0x7d   : > { %v2803_v55 = vmul.f32 %v514_v53, %v2628_v2  ;;  %v521_v57 = vsel %vm519_vm8, %v520_v45, %v518_v27  ;;  %v525_v1 = vsel %vm524_vm9, %v2730_v38, %v523_v49  ;;  %v537_v58 = vmul.f32 %v2347_v50, %v2744_v43 }
  0x7e   : > { %v2349_v29 = vpop.eup %2348  ;;  %2192 = vmatpush3.xpose.msra.mxu0 %v2794_v51  ;;  %v2813_v44 = vmul.f32 %v521_v57, %v2637_v6  ;;  %v528_v61 = vsel %vm526_vm10, %v527_v46, %v525_v1  ;;  %v532_v2 = vsel %vm531_vm11, %v2738_v41, %v530_v42  ;;  %v365_v34 = vrot.slane %v364_v33, 4 }
  0x7f   : > { %v2820_v45 = vpop.eup %2350  ;;  %2197 = vmatpush3.xpose.msra.mxu1 %v2803_v55  ;;  %2201 = vmatprep.subr.mxu0 %v2518_v3  ;;  %v2825_v62 = vmul.f32 %v528_v61, %v2646_v10  ;;  %v535_v6 = vsel %vm533_vm12, %v534_v54, %v532_v2  ;;  %v539_v38 = vsel %vm538_vm13, %v2744_v43, %v537_v58  ;;  %v271_v46 = vmul.f32 0.25, %v230_v35 }
  0x80   : > { %2206 = vmatprep.subr.mxu1 %v2518_v3  ;;  %v542_v0 = vsel %vm540_vm14, %v541_v60, %v539_v38  ;;  %v544_v5 = vmul.f32 %v2349_v29, %v2755_v47  ;;  %2352 = vrsqrt.f32 %v2820_v45  ;;  %v2839_v10 = vmul.f32 %v535_v6, %v2651_v13 }
  0x81   : > { %2194 = vmatmul.mubr.f32.vlgmr.msra.gmra.mrb[0].mxu0 %v2794_v51  ;;  %v2842_v41 = vmul.f32 %v542_v0, %v2654_v14  ;;  %v241_v54 = vrot.slane %v2774_v15, 2  ;;  %vm552_vm3 = vcmp.eq.f32.partialorder %v2820_v45, inf  ;;  %v366_v60 = vadd.f32 %v365_v34, %v364_v33 }
  0x82   : > { %2199 = vmatmul.mubr.f32.vlgmr.msra.gmra.mrb[0].mxu1 %v2803_v55  ;;  %2202 = vmatpush3.xpose.msra.mxu0 %v2813_v44  ;;  %v546_v43 = vsel %vm545_vm15, %v2755_v47, %v544_v5  ;;  %v301_v13 = vmul.f32 %v285_v23, %v285_v23  ;;  %vm554_vm4 = vcmp.eq.f32.partialorder %v2820_v45, 0.0  ;;  %v286_v11 = vsub.f32 %v2695_v52, %v270_v26 }
  0x83   : > { %2207 = vmatpush3.xpose.msra.mxu1 %v2825_v62  ;;  %2203 = vmatprep.mubr.msk.f32.mxu0 %vm2519_vm2, %v2518_v3  ;;  %v549_v14 = vsel %vm547_vm0, %v548_v4, %v546_v43  ;;  %v287_v12 = vsub.f32 %v2698_v56, %v271_v46  ;;  %v367_v21 = vrot.slane %v366_v60, 2  ;;  %v237_v23 = vadd.f32 %v236_v7, %v235_v24 }
  0x84   : > { %2208 = vmatprep.mubr.msk.f32.mxu1 %vm2519_vm2, %v2518_v3  ;;  %2211 = vmatprep.subr.mxu0 %v2518_v3  ;;  %v2867_v18 = vmul.f32 %v549_v14, %v2659_v19  ;;  %v371_v22 = vsel %vm146_vm1, %v301_v13, 0.0  ;;  %v302_v4 = vmul.f32 %v286_v11, %v286_v11  ;;  %v242_v30 = vadd.f32 %v241_v54, %v2774_v15 }
  0x85   : > { %2204 = vmatmul.mubr.f32.vlgmr.msra.gmra.mrb[2].mxu0 %v2813_v44  ;;  %2216 = vmatprep.subr.mxu1 %v2518_v3  ;;  %v372_v47 = vrot.slane %v371_v22, 4  ;;  %v303_v25 = vmul.f32 %v287_v12, %v287_v12  ;;  %v368_v32 = vadd.f32 %v367_v21, %v366_v60  ;;  %v272_v19 = vmul.f32 0.25, %v237_v23 }
  0x86   : > { %2209 = vmatmul.mubr.f32.vlgmr.msra.gmra.mrb[2].mxu1 %v2825_v62  ;;  %2212 = vmatpush3.xpose.msra.mxu0 %v2839_v10  ;;  %v247_v26 = vadd.f32 %v246_v8, %v2736_v40  ;;  %v254_v35 = vadd.f32 %v253_v9, %v2778_v16  ;;  %v378_v36 = vsel %vm146_vm1, %v302_v4, 0.0  ;;  %v243_v37 = vrot.slane %v242_v30, 1 }
  0x87   : > { %2217 = vmatpush3.xpose.msra.mxu1 %v2842_v41  ;;  %2213 = vmatprep.mubr.msk.f32.mxu0 %vm2519_vm2, %v2518_v3  ;;  %v373_v24 = vadd.f32 %v372_v47, %v371_v22  ;;  %v385_v15 = vsel %vm146_vm1, %v303_v25, 0.0  ;;  %v369_v39 = vrot.slane %v368_v32, 1  ;;  %v379_v40 = vrot.slane %v378_v36, 4 }
  0x88   : > { %2218 = vmatprep.mubr.msk.f32.mxu1 %vm2519_vm2, %v2518_v3  ;;  %2221 = vmatprep.subr.mxu0 %v2518_v3  ;;  %v386_v49 = vrot.slane %v385_v15, 4  ;;  %v288_v16 = vsub.f32 %v2703_v63, %v272_v19  ;;  %v555_v33 = vand.u32 2147483648, %v2820_v45  ;;  %v244_v53 = vadd.f32 %v243_v37, %v242_v30 }
  0x89   : > { %2214 = vmatmul.mubr.f32.vlgmr.msra.gmra.mrb[4].mxu0 %v2839_v10  ;;  %2226 = vmatprep.subr.mxu1 %v2518_v3  ;;  %v374_v50 = vrot.slane %v373_v24, 2  ;;  %v248_v27 = vrot.slane %v247_v26, 2  ;;  %v370_v57 = vadd.f32 %v369_v39, %v368_v32  ;;  %v380_v1 = vadd.f32 %v379_v40, %v378_v36 }
  0x8a   : > { %v2353_v42 = vpop.eup %2352  ;;  %2219 = vmatmul.mubr.f32.vlgmr.msra.gmra.mrb[4].mxu1 %v2842_v41  ;;  %2222 = vmatpush3.xpose.msra.mxu0 %v2867_v18  ;;  %v387_v58 = vadd.f32 %v386_v49, %v385_v15  ;;  %v255_v29 = vrot.slane %v254_v35, 2  ;;  %v304_v34 = vmul.f32 %v288_v16, %v288_v16  ;;  %v273_v6 = vmul.f32 0.25, %v244_v53 }
  0x8b   : > { %v551_v61 = vmul.f32 %v2353_v42, %v2820_v45  ;;  %2223 = vmatprep.mubr.msk.f32.mxu0 %vm2519_vm2, %v2518_v3  ;;  %2228 = vmatprep.mubr.msk.f32.mxu1 %vm2519_vm2, %v2518_v3  ;;  %v375_v2 = vadd.f32 %v374_v50, %v373_v24  ;;  %v429_v38 = vmul.f32 0.33333334, %v370_v57  ;;  %v381_v46 = vrot.slane %v380_v1, 2 }
  0x8c   : > { %2231 = vmatprep.subr.mxu0 %v2518_v3  ;;  %v388_v0 = vrot.slane %v387_v58, 2  ;;  %v249_v5 = vadd.f32 %v248_v27, %v247_v26  ;;  %v392_v8 = vsel %vm146_vm1, %v304_v34, 0.0  ;;  %v289_v43 = vsub.f32 %v2712_v17, %v273_v6 }
  0x8d   : > { %v553_v7 = vsel %vm552_vm3, %v2820_v45, %v551_v61  ;;  %2224 = vmatmul.mubr.f32.vlgmr.msra.gmra.mrb[6].mxu0 %v2867_v18  ;;  %v376_v54 = vrot.slane %v375_v2, 1  ;;  %v445_v13 = vadd.f32 1e-08, %v429_v38  ;;  %v382_v9 = vadd.f32 %v381_v46, %v380_v1 }
  0x8e   : > { %v556_v60 = vsel %vm554_vm4, %v555_v33, %v553_v7  ;;  %2233 = vmatprep.mubr.msk.f32.mxu0 %vm2519_vm2, %v2518_v3  ;;  %v389_v14 = vadd.f32 %v388_v0, %v387_v58  ;;  %v393_v21 = vrot.slane %v392_v8, 4  ;;  %v305_v22 = vmul.f32 %v289_v43, %v289_v43 }
  0x8f   : > { %v2908_v11 = vmul.f32 %v556_v60, %v2662_v20  ;;  %v377_v12 = vadd.f32 %v376_v54, %v375_v2  ;;  %v461_v23 = vmul.f32 256.0, %v445_v13  ;;  %v383_v47 = vrot.slane %v382_v9, 1 }
  0x90   : > { %v390_v4 = vrot.slane %v389_v14, 1  ;;  %v250_v25 = vrot.slane %v249_v5, 1  ;;  %v394_v30 = vadd.f32 %v393_v21, %v392_v8  ;;  %v399_v32 = vsel %vm146_vm1, %v305_v22, 0.0 }
  0x91   : > { %2227 = vmatpush3.xpose.msra.mxu1 %v2908_v11  ;;  %v430_v45 = vmul.f32 0.33333334, %v377_v12  ;;  %v256_v19 = vadd.f32 %v255_v29, %v254_v35  ;;  %2354 = vrcp.f32 %v461_v23  ;;  %v384_v26 = vadd.f32 %v383_v47, %v382_v9 }
  0x92   : > { %2236 = vmatprep.subr.mxu1 %v2518_v3  ;;  %v391_v20 = vadd.f32 %v390_v4, %v389_v14  ;;  %v400_v24 = vrot.slane %v399_v32, 4  ;;  %v395_v15 = vrot.slane %v394_v30, 2  ;;  %v251_v37 = vadd.f32 %v250_v25, %v249_v5 }
  0x93   : > { %v446_v36 = vadd.f32 1e-08, %v430_v45  ;;  %v257_v39 = vrot.slane %v256_v19, 1  ;;  %v431_v40 = vmul.f32 0.33333334, %v384_v26  ;;  %v629_v33 = vmul.f32 %v2794_v51, %v2794_v51 }
  0x94   : > { %2229 = vmatmul.mubr.f32.vlgmr.msra.gmra.mrb[6].mxu1 %v2908_v11  ;;  %v432_v49 = vmul.f32 0.33333334, %v391_v20  ;;  %v401_v16 = vadd.f32 %v400_v24, %v399_v32  ;;  %v396_v35 = vadd.f32 %v395_v15, %v394_v30  ;;  %v274_v53 = vmul.f32 0.25, %v251_v37 }
  0x95   : > { %v462_v50 = vmul.f32 256.0, %v446_v36  ;;  %2238 = vmatprep.mubr.msk.f32.mxu1 %vm2519_vm2, %v2518_v3  ;;  %v258_v27 = vadd.f32 %v257_v39, %v256_v19  ;;  %v447_v42 = vadd.f32 1e-08, %v431_v40  ;;  %v645_v58 = vsel %vm146_vm1, %v629_v33, 0.0 }
  0x96   : > { %v448_v57 = vadd.f32 1e-08, %v432_v49  ;;  %v402_v1 = vrot.slane %v401_v16, 2  ;;  %v397_v29 = vrot.slane %v396_v35, 1  ;;  %v290_v61 = vsub.f32 %v2721_v28, %v274_v53  ;;  %646 = vadd.xlane.f32.xlu0 %v645_v58 }
  0x97   : > { %2356 = vrcp.f32 %v462_v50  ;;  %v275_v2 = vmul.f32 0.25, %v258_v27  ;;  %v463_v34 = vmul.f32 256.0, %v447_v42  ;;  %v630_v38 = vmul.f32 %v2803_v55, %v2803_v55 }
  0x98   : > { %v464_v51 = vmul.f32 256.0, %v448_v57  ;;  %v403_v6 = vadd.f32 %v402_v1, %v401_v16  ;;  %v398_v46 = vadd.f32 %v397_v29, %v396_v35  ;;  %v306_v0 = vmul.f32 %v290_v61, %v290_v61 }
  0x99   : > { %v291_v5 = vsub.f32 %v2764_v59, %v275_v2  ;;  %v631_v7 = vmul.f32 %v2813_v44, %v2813_v44  ;;  %2358 = vrcp.f32 %v463_v34  ;;  %v648_v8 = vsel %vm146_vm1, %v630_v38, 0.0 }
  0x9a   : > { %v404_v54 = vrot.slane %v403_v6, 1  ;;  %v632_v43 = vmul.f32 %v2825_v62, %v2825_v62  ;;  %2360 = vrcp.f32 %v464_v51  ;;  %v433_v60 = vmul.f32 0.33333334, %v398_v46  ;;  %649 = vadd.xlane.f32.xlu0 %v648_v8 }
  0x9b   : > { %v406_v13 = vsel %vm146_vm1, %v306_v0, 0.0  ;;  %v307_v9 = vmul.f32 %v291_v5, %v291_v5  ;;  %v2355_v55 = vpop.eup %2354  ;;  %v651_v21 = vsel %vm146_vm1, %v631_v7, 0.0  ;;  %v633_v25 = vmul.f32 %v2839_v10, %v2839_v10 }
  0x9c   : > { %v405_v14 = vadd.f32 %v404_v54, %v403_v6  ;;  %v407_v12 = vrot.slane %v406_v13, 4  ;;  %2362 = vrsqrt.f32 %v2355_v55  ;;  %652 = vadd.xlane.f32.xlu1 %v651_v21  ;;  %v654_v44 = vsel %vm146_vm1, %v632_v43, 0.0 }
  0x9d   : > { %v449_v22 = vadd.f32 1e-08, %v433_v60  ;;  %v413_v62 = vsel %vm146_vm1, %v307_v9, 0.0  ;;  %v634_v45 = vmul.f32 %v2842_v41, %v2842_v41  ;;  %v635_v30 = vmul.f32 %v2867_v18, %v2867_v18 }
  0x9e   : > { %v434_v23 = vmul.f32 0.33333334, %v405_v14  ;;  %v408_v47 = vadd.f32 %v407_v12, %v406_v13  ;;  %v414_v4 = vrot.slane %v413_v62, 4  ;;  %v657_v36 = vsel %vm146_vm1, %v633_v25, 0.0 }
  0x9f   : > { %v465_v32 = vmul.f32 256.0, %v449_v22  ;;  %658 = vadd.xlane.f32.xlu0 %v657_v36  ;;  %v660_v15 = vsel %vm146_vm1, %v634_v45, 0.0  ;;  %v663_v10 = vsel %vm146_vm1, %v635_v30, 0.0  ;;  %v636_v41 = vmul.f32 %v2908_v11, %v2908_v11 }
  0xa0   : > { %v450_v19 = vadd.f32 1e-08, %v434_v23  ;;  %v409_v26 = vrot.slane %v408_v47, 2  ;;  %v415_v24 = vadd.f32 %v414_v4, %v413_v62  ;;  %655 = vadd.xlane.f32.xlu1 %v654_v44  ;;  %vm559_vm5 = vcmp.eq.f32.partialorder %v2355_v55, inf }
  0xa1   : > { %v2357_v20 = vpop.eup %2356  ;;  %v666_v16 = vsel %vm146_vm1, %v636_v41, 0.0  ;;  %v562_v50 = vand.u32 2147483648, %v2355_v55  ;;  %vm561_vm6 = vcmp.eq.f32.partialorder %v2355_v55, 0.0 }
  0xa2   : > { %2364 = vrsqrt.f32 %v2357_v20  ;;  %v466_v37 = vmul.f32 256.0, %v450_v19  ;;  %v410_v18 = vadd.f32 %v409_v26, %v408_v47  ;;  %v416_v39 = vrot.slane %v415_v24, 2 }
  0xa3   : > { %2366 = vrcp.f32 %v465_v32  ;;  %v2359_v40 = vpop.eup %2358  ;;  %664 = vadd.xlane.f32.xlu0 %v663_v10  ;;  %vm566_vm7 = vcmp.eq.f32.partialorder %v2357_v20, inf  ;;  %vm568_vm8 = vcmp.eq.f32.partialorder %v2357_v20, 0.0  ;;  %v569_v34 = vand.u32 2147483648, %v2357_v20 }
  0xa4   : > { %v2943_v49 = vpop.eup %2360  ;;  %2368 = vrsqrt.f32 %v2359_v40  ;;  %661 = vadd.xlane.f32.xlu1 %v660_v15  ;;  %v411_v35 = vrot.slane %v410_v18, 1  ;;  %v417_v11 = vadd.f32 %v416_v39, %v415_v24  ;;  %vm573_vm9 = vcmp.eq.f32.partialorder %v2359_v40, inf }
  0xa5   : > { %2370 = vrsqrt.f32 %v2943_v49  ;;  %vm575_vm10 = vcmp.eq.f32.partialorder %v2359_v40, 0.0  ;;  %v576_v0 = vand.u32 2147483648, %v2359_v40  ;;  %vm580_vm11 = vcmp.eq.f32.partialorder %v2943_v49, inf }
  0xa6   : > { %v2363_v33 = vpop.eup %2362  ;;  %2372 = vrcp.f32 %v466_v37  ;;  %v412_v27 = vadd.f32 %v411_v35, %v410_v18  ;;  %v418_v42 = vrot.slane %v417_v11, 1  ;;  %vm582_vm12 = vcmp.eq.f32.partialorder %v2943_v49, 0.0 }
  0xa7   : > { %v558_v53 = vmul.f32 %v2363_v33, %v2355_v55  ;;  %v583_v13 = vand.u32 2147483648, %v2943_v49 }
  0xa8   : > { %667 = vadd.xlane.f32.xlu1 %v666_v16  ;;  %v435_v58 = vmul.f32 0.33333334, %v412_v27  ;;  %v419_v29 = vadd.f32 %v418_v42, %v417_v11 }
  0xa9   : > { %v560_v57 = vsel %vm559_vm5, %v2355_v55, %v558_v53 }
  0xaa   : > { %v563_v1 = vsel %vm561_vm6, %v562_v50, %v560_v57  ;;  %v451_v38 = vadd.f32 1e-08, %v435_v58  ;;  %v436_v46 = vmul.f32 0.33333334, %v419_v29 }
  0xab   : > { %v621_v2 = vmul.f32 %v563_v1, %v2687_v31 }
  0xac   : > { %v2365_v61 = vpop.eup %2364  ;;  %v467_v31 = vmul.f32 256.0, %v451_v38  ;;  %v452_v54 = vadd.f32 1e-08, %v436_v46  ;;  %v1829_v46 = vlaneseq }
  0xad   : > { %v2948_v51 = vpop.eup %2366  ;;  %v565_v6 = vmul.f32 %v2365_v61, %v2357_v20  ;;  %2232 = vmatpush3.xpose.msra.mxu0 %v621_v2  ;;  %v637_v9 = vmul.f32 %v621_v2, %v621_v2 }
  0xae   : > { %2374 = vrsqrt.f32 %v2948_v51  ;;  %v2369_v5 = vpop.eup %2368  ;;  %2241 = vmatprep.subr.mxu0 %v2518_v3  ;;  %v468_v21 = vmul.f32 256.0, %v452_v54  ;;  %vm587_vm13 = vcmp.eq.f32.partialorder %v2948_v51, inf  ;;  %v590_v19 = vand.u32 2147483648, %v2948_v51 }
  0xaf   : > { %v567_v7 = vsel %vm566_vm7, %v2357_v20, %v565_v6  ;;  %v2371_v8 = vpop.eup %2370  ;;  %v572_v60 = vmul.f32 %v2369_v5, %v2359_v40  ;;  %2376 = vrcp.f32 %v467_v31  ;;  %v669_v62 = vsel %vm146_vm1, %v637_v9, 0.0 }
  0xb0   : > { %v570_v43 = vsel %vm568_vm8, %v569_v34, %v567_v7  ;;  %v2373_v55 = vpop.eup %2372  ;;  %2234 = vmatmul.mubr.f32.vlgmr.msra.gmra.mrb[8].mxu0 %v621_v2  ;;  %v579_v12 = vmul.f32 %v2371_v8, %v2943_v49  ;;  %670 = vadd.xlane.f32.xlu0 %v669_v62  ;;  %vm589_vm14 = vcmp.eq.f32.partialorder %v2948_v51, 0.0  ;;  %v3003_v7 = vshrl.u32 %v1829_v46, 7 }
  0xb1   : > { %v622_v14 = vmul.f32 %v570_v43, %v2690_v48  ;;  %v574_v44 = vsel %vm573_vm9, %v2359_v40, %v572_v60  ;;  %2243 = vmatprep.mubr.msk.f32.mxu0 %vm2519_vm2, %v2518_v3  ;;  %2378 = vrsqrt.f32 %v2373_v55  ;;  %vm594_vm15 = vcmp.eq.f32.partialorder %v2373_v55, inf }
  0xb2   : > { %v577_v22 = vsel %vm575_vm10, %v576_v0, %v574_v44  ;;  %v581_v23 = vsel %vm580_vm11, %v2943_v49, %v579_v12  ;;  %2380 = vrcp.f32 %v468_v21  ;;  %v597_v41 = vand.u32 2147483648, %v2373_v55 }
  0xb3   : > { %2237 = vmatpush3.xpose.msra.mxu1 %v622_v14  ;;  %v623_v48 = vmul.f32 %v577_v22, %v2695_v52  ;;  %v584_v47 = vsel %vm582_vm12, %v583_v13, %v581_v23  ;;  %v638_v4 = vmul.f32 %v622_v14, %v622_v14  ;;  %vm596_vm0 = vcmp.eq.f32.partialorder %v2373_v55, 0.0 }
  0xb4   : > { %2246 = vmatprep.subr.mxu1 %v2518_v3  ;;  %v624_v25 = vmul.f32 %v584_v47, %v2698_v56 }
  0xb5   : > { %2242 = vmatpush3.xpose.msra.mxu0 %v623_v48  ;;  %v672_v45 = vsel %vm146_vm1, %v638_v4, 0.0  ;;  %v639_v30 = vmul.f32 %v623_v48, %v623_v48 }
  0xb6   : > { %2239 = vmatmul.mubr.f32.vlgmr.msra.gmra.mrb[8].mxu1 %v622_v14  ;;  %v640_v52 = vmul.f32 %v624_v25, %v624_v25  ;;  %2251 = vmatprep.subr.mxu0 %v2518_v3 }
  0xb7   : > { %2247 = vmatpush3.xpose.msra.mxu1 %v624_v25  ;;  %2248 = vmatprep.mubr.msk.f32.mxu1 %vm2519_vm2, %v2518_v3  ;;  %v675_v56 = vsel %vm146_vm1, %v639_v30, 0.0 }
  0xb8   : > { %v2375_v32 = vpop.eup %2374  ;;  %2256 = vmatprep.subr.mxu1 %v2518_v3  ;;  %2244 = vmatmul.mubr.f32.vlgmr.msra.gmra.mrb[10].mxu0 %v623_v48  ;;  %v678_v20 = vsel %vm146_vm1, %v640_v52, 0.0 }
  0xb9   : > { %v586_v26 = vmul.f32 %v2375_v32, %v2948_v51  ;;  %673 = vadd.xlane.f32.xlu1 %v672_v45  ;;  %2253 = vmatprep.mubr.msk.f32.mxu0 %vm2519_vm2, %v2518_v3  ;;  %v2377_v24 = vpop.eup %2376 }
  0xba   : > { %2249 = vmatmul.mubr.f32.vlgmr.msra.gmra.mrb[10].mxu1 %v624_v25  ;;  %676 = vadd.xlane.f32.xlu0 %v675_v56  ;;  %2382 = vrsqrt.f32 %v2377_v24  ;;  %vm601_vm3 = vcmp.eq.f32.partialorder %v2377_v24, inf  ;;  %v604_v53 = vand.u32 2147483648, %v2377_v24  ;;  %vm603_vm4 = vcmp.eq.f32.partialorder %v2377_v24, 0.0 }
  0xbb   : > { %v588_v36 = vsel %vm587_vm13, %v2948_v51, %v586_v26  ;;  %2258 = vmatprep.mubr.msk.f32.mxu1 %vm2519_vm2, %v2518_v3  ;;  %v2379_v15 = vpop.eup %2378 }
  0xbc   : > { %v591_v10 = vsel %vm589_vm14, %v590_v19, %v588_v36  ;;  %v2381_v37 = vpop.eup %2380  ;;  %v593_v39 = vmul.f32 %v2379_v15, %v2373_v55 }
  0xbd   : > { %v625_v18 = vmul.f32 %v591_v10, %v2703_v63  ;;  %679 = vadd.xlane.f32.xlu1 %v678_v20  ;;  %2384 = vrsqrt.f32 %v2381_v37  ;;  %vm608_vm5 = vcmp.eq.f32.partialorder %v2381_v37, inf  ;;  %v611_v42 = vand.u32 2147483648, %v2381_v37 }
  0xbe   : > { %v595_v40 = vsel %vm594_vm15, %v2373_v55, %v593_v39  ;;  %vm610_vm6 = vcmp.eq.f32.partialorder %v2381_v37, 0.0 }
  0xbf   : > { %2252 = vmatpush3.xpose.msra.mxu0 %v625_v18  ;;  %v641_v49 = vmul.f32 %v625_v18, %v625_v18  ;;  %v598_v16 = vsel %vm596_vm0, %v597_v41, %v595_v40 }
  0xc0   : > { %2261 = vmatprep.subr.mxu0 %v2518_v3  ;;  %v626_v33 = vmul.f32 %v598_v16, %v2712_v17 }
  0xc1   : > { %v681_v50 = vsel %vm146_vm1, %v641_v49, 0.0 }
  0xc2   : > { %2254 = vmatmul.mubr.f32.vlgmr.msra.gmra.mrb[12].mxu0 %v625_v18  ;;  %682 = vadd.xlane.f32.xlu0 %v681_v50  ;;  %v642_v63 = vmul.f32 %v626_v33, %v626_v33 }
  0xc3   : > { %2257 = vmatpush3.xpose.msra.mxu1 %v626_v33  ;;  %2263 = vmatprep.mubr.msk.f32.mxu0 %vm2519_vm2, %v2518_v3 }
  0xc4   : > { %2266 = vmatprep.subr.mxu1 %v2518_v3  ;;  %v684_v35 = vsel %vm146_vm1, %v642_v63, 0.0  ;;  %v2383_v11 = vpop.eup %2382 }
  0xc5   : > { %685 = vadd.xlane.f32.xlu1 %v684_v35  ;;  %v600_v27 = vmul.f32 %v2383_v11, %v2377_v24 }
  0xc6   : > { %2259 = vmatmul.mubr.f32.vlgmr.msra.gmra.mrb[12].mxu1 %v626_v33 }
  0xc7   : > { %2268 = vmatprep.mubr.msk.f32.mxu1 %vm2519_vm2, %v2518_v3  ;;  %v2385_v17 = vpop.eup %2384  ;;  %v602_v57 = vsel %vm601_vm3, %v2377_v24, %v600_v27 }
  0xc8   : > { %v607_v1 = vmul.f32 %v2385_v17, %v2381_v37  ;;  %v605_v58 = vsel %vm603_vm4, %v604_v53, %v602_v57 }
  0xc9   : > { %v627_v29 = vmul.f32 %v605_v58, %v2721_v28  ;;  %v3001_v28 = vand.u32 127, %v1829_v46 }
  0xca   : > { %v609_v61 = vsel %vm608_vm5, %v2381_v37, %v607_v1 }
  0xcb   : > { %v612_v2 = vsel %vm610_vm6, %v611_v42, %v609_v61  ;;  %2262 = vmatpush3.xpose.msra.mxu0 %v627_v29  ;;  %v643_v51 = vmul.f32 %v627_v29, %v627_v29  ;;  %vm2084_vm2 = vcmp.eq.s32.totalorder (!%p2153_p7), %v3003_v7, %v3001_v28 }
  0xcc   : > { %v628_v34 = vmul.f32 %v612_v2, %v2764_v59  ;;  %v3007_v59 = vsub.s32 %v3001_v28, %v3003_v7 }
  0xcd   : > { %v687_v6 = vsel %vm146_vm1, %v643_v51, 0.0 }
  0xce   : > { %2267 = vmatpush3.xpose.msra.mxu1 %v628_v34  ;;  %v644_v38 = vmul.f32 %v628_v34, %v628_v34  ;;  %2264 = vmatmul.mubr.f32.vlgmr.msra.gmra.mrb[14].mxu0 %v627_v29 }
  0xcf   : > { %688 = vadd.xlane.f32.xlu0 %v687_v6 }
  0xd0   : > { %v690_v3 = vsel %vm146_vm1, %v644_v38, 0.0  ;;  %vm2042_vm1 = vcmask 27648  }
  0xd1   : > { %2269 = vmatmul.mubr.f32.vlgmr.msra.gmra.mrb[14].mxu1 %v628_v34  ;;  %691 = vadd.xlane.f32.xlu1 %v690_v3 }
 0x123   : > { %v647_v0 = vpop.xlane.xlu0 %646 }
 0x124   : > { %v1834_v43 = vrot.slane %v647_v0, %v3007_v59 }
 0x126   : > { %v1945_v12 = vadd.f32 %v1834_v43, %v647_v0 }
 0x127   : > { %v650_v31 = vpop.xlane.xlu0 %649 }
 0x128   : > { %v1838_v8 = vrot.slane %v650_v31, %v3007_v59 }
 0x129   : > { %v653_v5 = vpop.xlane.xlu1 %652 }
 0x12a   : > { %v1946_v13 = vadd.f32 %v1838_v8, %v650_v31  ;;  %v1842_v21 = vrot.slane %v653_v5, %v3007_v59 }
 0x12c   : > { %v659_v60 = vpop.xlane.xlu0 %658  ;;  %v1947_v32 = vadd.f32 %v1842_v21, %v653_v5 }
 0x12d   : > { %v656_v54 = vpop.xlane.xlu1 %655  ;;  %v1850_v30 = vrot.slane %v659_v60, %v3007_v59 }
 0x12e   : > { %v1846_v55 = vrot.slane %v656_v54, %v3007_v59 }
 0x12f   : > { %v1949_v40 = vadd.f32 %v1850_v30, %v659_v60 }
 0x130   : > { %v1948_v25 = vadd.f32 %v1846_v55, %v656_v54  ;;  %v665_v10 = vpop.xlane.xlu0 %664 }
 0x131   : > { %v662_v14 = vpop.xlane.xlu1 %661  ;;  %v1858_v11 = vrot.slane %v665_v10, %v3007_v59 }
 0x132   : > { %v1854_v52 = vrot.slane %v662_v14, %v3007_v59 }
 0x133   : > { %v1951_v34 = vadd.f32 %v1858_v11, %v665_v10 }
 0x134   : > { %v1950_v49 = vadd.f32 %v1854_v52, %v662_v14 }
 0x135   : > { %v668_v1 = vpop.xlane.xlu1 %667 }
 0x136   : > { %v1862_v3 = vrot.slane %v668_v1, %v3007_v59 }
 0x138   : > { %v1952_v54 = vadd.f32 %v1862_v3, %v668_v1 }
 0x154   : > { %v759_v9 = vpop.f32.mrb[0].mxu0 }
 0x155   : > { %v1961_v44 = vmul.f32 2.0, %v759_v9  ;;  %v829_v22 = vpop.f32.mrb[0].mxu1  ;;  %v2195_v23 = vpop.f32.mrb[1].mxu0 }
 0x156   : > { %v1962_v48 = vmul.f32 2.0, %v829_v22  ;;  %v2200_v47 = vpop.f32.mrb[1].mxu1 }
 0x157   : > { %v1977_v62 = vsub.f32 %v1945_v12, %v1961_v44 }
 0x158   : > { %v1978_v4 = vsub.f32 %v1946_v13, %v1962_v48  ;;  %v899_v45 = vpop.f32.mrb[2].mxu0 }
 0x159   : > { %v1994_v19 = vsub.f32 0.0, %v1977_v62  ;;  %v1963_v56 = vmul.f32 2.0, %v899_v45  ;;  %v2205_v26 = vpop.f32.mrb[3].mxu0  ;;  %v969_v20 = vpop.f32.mrb[2].mxu1 }
 0x15a   : > { %v1995_v24 = vsub.f32 0.0, %v1978_v4  ;;  %v1964_v36 = vmul.f32 2.0, %v969_v20  ;;  %v2210_v15 = vpop.f32.mrb[3].mxu1 }
 0x15b   : > { %v2010_v41 = vmul.f32 1.442695, %v1994_v19  ;;  %v1979_v37 = vsub.f32 %v1947_v32, %v1963_v56 }
 0x15c   : > { %v2012_v18 = vmul.f32 1.442695, %v1995_v24  ;;  %v1980_v39 = vsub.f32 %v1948_v25, %v1964_v36  ;;  %v1039_v16 = vpop.f32.mrb[4].mxu0 }
 0x15d   : > { %2386 = vpow2.f32 %v2010_v41  ;;  %v1996_v33 = vsub.f32 0.0, %v1979_v37  ;;  %v1965_v50 = vmul.f32 2.0, %v1039_v16  ;;  %v2215_v63 = vpop.f32.mrb[5].mxu0  ;;  %v1109_v35 = vpop.f32.mrb[4].mxu1 }
 0x15e   : > { %2388 = vpow2.f32 %v2012_v18  ;;  %v1997_v53 = vsub.f32 0.0, %v1980_v39  ;;  %v1966_v27 = vmul.f32 2.0, %v1109_v35  ;;  %v2220_v17 = vpop.f32.mrb[5].mxu1  ;;  %v671_v37 = vpop.xlane.xlu0 %670 }
 0x15f   : > { %v2014_v42 = vmul.f32 1.442695, %v1996_v33  ;;  %v1981_v57 = vsub.f32 %v1949_v40, %v1965_v50  ;;  %v674_v18 = vpop.xlane.xlu1 %673  ;;  %v1866_v39 = vrot.slane %v671_v37, %v3007_v59 }
 0x160   : > { %v2016_v58 = vmul.f32 1.442695, %v1997_v53  ;;  %v1982_v29 = vsub.f32 %v1950_v49, %v1966_v27  ;;  %v1179_v61 = vpop.f32.mrb[6].mxu0  ;;  %v1870_v40 = vrot.slane %v674_v18, %v3007_v59 }
 0x161   : > { %2390 = vpow2.f32 %v2014_v42  ;;  %v1998_v2 = vsub.f32 0.0, %v1981_v57  ;;  %v1967_v51 = vmul.f32 2.0, %v1179_v61  ;;  %v2225_v6 = vpop.f32.mrb[7].mxu0  ;;  %v1953_v16 = vadd.f32 %v1866_v39, %v671_v37 }
 0x162   : > { %2392 = vpow2.f32 %v2016_v58  ;;  %v1999_v38 = vsub.f32 0.0, %v1982_v29  ;;  %v677_v35 = vpop.xlane.xlu0 %676  ;;  %v1954_v53 = vadd.f32 %v1870_v40, %v674_v18 }
 0x163   : > { %v2018_v46 = vmul.f32 1.442695, %v1998_v2  ;;  %v1983_v0 = vsub.f32 %v1951_v34, %v1967_v51  ;;  %v680_v63 = vpop.xlane.xlu1 %679  ;;  %v1874_v57 = vrot.slane %v677_v35, %v3007_v59 }
 0x164   : > { %v2020_v5 = vmul.f32 1.442695, %v1999_v38  ;;  %v1878_v27 = vrot.slane %v680_v63, %v3007_v59 }
 0x165   : > { %2394 = vpow2.f32 %v2018_v46  ;;  %v2000_v31 = vsub.f32 0.0, %v1983_v0  ;;  %v1955_v51 = vadd.f32 %v1874_v57, %v677_v35 }
 0x166   : > { %2396 = vpow2.f32 %v2020_v5  ;;  %v1956_v2 = vadd.f32 %v1878_v27, %v680_v63 }
 0x167   : > { %v2387_v8 = vpop.eup %2386  ;;  %v2022_v43 = vmul.f32 1.442695, %v2000_v31  ;;  %v1249_v60 = vpop.f32.mrb[6].mxu1 }
 0x168   : > { %v2389_v13 = vpop.eup %2388  ;;  %v2043_v9 = vsel %vm2042_vm1, %v2387_v8, 0.0  ;;  %v1968_v55 = vmul.f32 2.0, %v1249_v60  ;;  %v2230_v14 = vpop.f32.mrb[7].mxu1 }
 0x169   : > { %v2044_v12 = vsel %vm2042_vm1, %v2389_v13, 0.0  ;;  %2398 = vpow2.f32 %v2022_v43  ;;  %v686_v13 = vpop.xlane.xlu1 %685 }
 0x16a   : > { %v2045_v21 = vadd.f32 %v2044_v12, %v2043_v9  ;;  %v1984_v44 = vsub.f32 %v1952_v54, %v1968_v55  ;;  %v683_v54 = vpop.xlane.xlu0 %682 }
 0x16b   : > { %v2391_v22 = vpop.eup %2390  ;;  %v1882_v55 = vrot.slane %v683_v54, %v3007_v59 }
 0x16c   : > { %v2393_v23 = vpop.eup %2392  ;;  %v2046_v48 = vsel %vm2042_vm1, %v2391_v22, 0.0  ;;  %v2001_v47 = vsub.f32 0.0, %v1984_v44 }
 0x16d   : > { %v2047_v62 = vadd.f32 %v2046_v48, %v2045_v21  ;;  %v2048_v4 = vsel %vm2042_vm1, %v2393_v23, 0.0  ;;  %v1886_v21 = vrot.slane %v686_v13, %v3007_v59  ;;  %v1957_v22 = vadd.f32 %v1882_v55, %v683_v54 }
 0x16e   : > { %v2024_v25 = vmul.f32 1.442695, %v2001_v47 }
 0x16f   : > { %v2395_v45 = vpop.eup %2394  ;;  %v2049_v30 = vadd.f32 %v2048_v4, %v2047_v62  ;;  %v1958_v4 = vadd.f32 %v1886_v21, %v686_v13 }
 0x170   : > { %v2397_v52 = vpop.eup %2396  ;;  %v2050_v32 = vsel %vm2042_vm1, %v2395_v45, 0.0  ;;  %2400 = vpow2.f32 %v2024_v25 }
 0x171   : > { %v2051_v19 = vadd.f32 %v2050_v32, %v2049_v30  ;;  %v2052_v56 = vsel %vm2042_vm1, %v2397_v52, 0.0 }
 0x173   : > { %v2399_v26 = vpop.eup %2398  ;;  %v2053_v20 = vadd.f32 %v2052_v56, %v2051_v19 }
 0x174   : > { %v2054_v24 = vsel %vm2042_vm1, %v2399_v26, 0.0 }
 0x175   : > { %v2055_v36 = vadd.f32 %v2054_v24, %v2053_v20 }
 0x17a   : > { %v2401_v15 = vpop.eup %2400 }
 0x17b   : > { %v2056_v10 = vsel %vm2042_vm1, %v2401_v15, 0.0  ;;  %v692_v15 = vpop.xlane.xlu1 %691 }
 0x17c   : > { %v2057_v41 = vadd.f32 %v2056_v10, %v2055_v36  ;;  %v689_v36 = vpop.xlane.xlu0 %688 }
 0x183   : > { %v1319_v49 = vpop.f32.mrb[8].mxu0 }
 0x184   : > { %v1969_v33 = vmul.f32 2.0, %v1319_v49  ;;  %v2235_v50 = vpop.f32.mrb[9].mxu0 }
 0x186   : > { %v1985_v11 = vsub.f32 %v1953_v16, %v1969_v33  ;;  %v1894_v16 = vrot.slane %v692_v15, %v3007_v59 }
 0x188   : > { %v2002_v17 = vsub.f32 0.0, %v1985_v11 }
 0x189   : > { %v1389_v42 = vpop.f32.mrb[8].mxu1 }
 0x18a   : > { %v1970_v1 = vmul.f32 2.0, %v1389_v42  ;;  %v2240_v58 = vpop.f32.mrb[9].mxu1  ;;  %v2026_v29 = vmul.f32 1.442695, %v2002_v17 }
 0x18b   : > { %v1459_v34 = vpop.f32.mrb[10].mxu0 }
 0x18c   : > { %v1986_v61 = vsub.f32 %v1954_v53, %v1970_v1  ;;  %2402 = vpow2.f32 %v2026_v29  ;;  %v1971_v6 = vmul.f32 2.0, %v1459_v34  ;;  %v2245_v38 = vpop.f32.mrb[11].mxu0  ;;  %v1960_v53 = vadd.f32 %v1894_v16, %v692_v15 }
 0x18d   : > { %v1529_v3 = vpop.f32.mrb[10].mxu1 }
 0x18e   : > { %v2003_v46 = vsub.f32 0.0, %v1986_v61  ;;  %v1972_v0 = vmul.f32 2.0, %v1529_v3  ;;  %v2250_v5 = vpop.f32.mrb[11].mxu1  ;;  %v1987_v31 = vsub.f32 %v1955_v51, %v1971_v6 }
 0x190   : > { %v2028_v8 = vmul.f32 1.442695, %v2003_v46  ;;  %v1988_v43 = vsub.f32 %v1956_v2, %v1972_v0  ;;  %v2004_v60 = vsub.f32 0.0, %v1987_v31 }
 0x192   : > { %2404 = vpow2.f32 %v2028_v8  ;;  %v2005_v9 = vsub.f32 0.0, %v1988_v43  ;;  %v2030_v14 = vmul.f32 1.442695, %v2004_v60  ;;  %v1993_v43 = vld [vmem:[#allocation5] sm:$0xf] }
 0x194   : > { %v2032_v12 = vmul.f32 1.442695, %v2005_v9  ;;  %2406 = vpow2.f32 %v2030_v14 }
 0x195   : > { %v1599_v44 = vpop.f32.mrb[12].mxu0 }
 0x196   : > { %2408 = vpow2.f32 %v2032_v12  ;;  %v1973_v23 = vmul.f32 2.0, %v1599_v44  ;;  %v2255_v48 = vpop.f32.mrb[13].mxu0  ;;  %v2403_v47 = vpop.eup %2402 }
 0x197   : > { %v2058_v62 = vsel %vm2042_vm1, %v2403_v47, 0.0 }
 0x198   : > { %v1989_v25 = vsub.f32 %v1957_v22, %v1973_v23  ;;  %v2059_v45 = vadd.f32 %v2058_v62, %v2057_v41  ;;  %v1890_v41 = vrot.slane %v689_v36, %v3007_v59 }
 0x199   : > { %v1669_v30 = vpop.f32.mrb[12].mxu1 }
 0x19a   : > { %v2006_v52 = vsub.f32 0.0, %v1989_v25  ;;  %v1974_v32 = vmul.f32 2.0, %v1669_v30  ;;  %v2260_v19 = vpop.f32.mrb[13].mxu1  ;;  %v1959_v11 = vadd.f32 %v1890_v41, %v689_v36 }
 0x19c   : > { %v2405_v56 = vpop.eup %2404  ;;  %v2034_v26 = vmul.f32 1.442695, %v2006_v52  ;;  %v1990_v20 = vsub.f32 %v1958_v4, %v1974_v32 }
 0x19d   : > { %v2060_v24 = vsel %vm2042_vm1, %v2405_v56, 0.0 }
 0x19e   : > { %v2061_v10 = vadd.f32 %v2060_v24, %v2059_v45  ;;  %2410 = vpow2.f32 %v2034_v26  ;;  %v2007_v37 = vsub.f32 0.0, %v1990_v20  ;;  %v2407_v18 = vpop.eup %2406 }
 0x19f   : > { %v2062_v40 = vsel %vm2042_vm1, %v2407_v18, 0.0 }
 0x1a0   : > { %v2409_v39 = vpop.eup %2408  ;;  %v2036_v49 = vmul.f32 1.442695, %v2007_v37  ;;  %v2063_v33 = vadd.f32 %v2062_v40, %v2061_v10 }
 0x1a1   : > { %v2064_v50 = vsel %vm2042_vm1, %v2409_v39, 0.0  ;;  %v1739_v35 = vpop.f32.mrb[14].mxu0 }
 0x1a2   : > { %2412 = vpow2.f32 %v2036_v49  ;;  %v2065_v63 = vadd.f32 %v2064_v50, %v2063_v33  ;;  %v1975_v27 = vmul.f32 2.0, %v1739_v35  ;;  %v2265_v17 = vpop.f32.mrb[15].mxu0 }
 0x1a4   : > { %v1809_v42 = vpop.f32.mrb[14].mxu1  ;;  %v1991_v57 = vsub.f32 %v1959_v11, %v1975_v27 }
 0x1a5   : > { %v1976_v1 = vmul.f32 2.0, %v1809_v42  ;;  %v2270_v58 = vpop.f32.mrb[15].mxu1 }
 0x1a6   : > { %v2008_v61 = vsub.f32 0.0, %v1991_v57 }
 0x1a7   : > { %v1992_v2 = vsub.f32 %v1960_v53, %v1976_v1 }
 0x1a8   : > { %v2411_v29 = vpop.eup %2410  ;;  %v2038_v51 = vmul.f32 1.442695, %v2008_v61 }
 0x1a9   : > { %v2066_v34 = vsel %vm2042_vm1, %v2411_v29, 0.0  ;;  %v2009_v6 = vsub.f32 0.0, %v1992_v2 }
 0x1aa   : > { %v2067_v59 = vadd.f32 %v2066_v34, %v2065_v63  ;;  %2414 = vpow2.f32 %v2038_v51 }
 0x1ab   : > { %v2040_v3 = vmul.f32 1.442695, %v2009_v6 }
 0x1ac   : > { %v2413_v38 = vpop.eup %2412 }
 0x1ad   : > { %v2068_v46 = vsel %vm2042_vm1, %v2413_v38, 0.0  ;;  %2416 = vpow2.f32 %v2040_v3 }
 0x1ae   : > { %v2069_v0 = vadd.f32 %v2068_v46, %v2067_v59 }
 0x1b4   : > { %v2415_v5 = vpop.eup %2414 }
 0x1b5   : > { %v2070_v31 = vsel %vm2042_vm1, %v2415_v5, 0.0 }
 0x1b6   : > { %v2071_v8 = vadd.f32 %v2070_v31, %v2069_v0 }
 0x1b7   : > { %v2417_v54 = vpop.eup %2416  ;;  %2079 = sbr.rel (%p2153_p7) target bundleno = 457 (0x1c9), region = 36 }
 0x1b8   : > { %v2072_v60 = vsel %vm2042_vm1, %v2417_v54, 0.0 }
 0x1b9   : > { %v2073_v13 = vadd.f32 %v2072_v60, %v2071_v8 }
 0x1bb   : > { %v2074_v9 = vadd.f32 %v2073_v13, %v1993_v43 }
 0x1bd   : > { %2075 = vst.msk [vmem:[#allocation5] sm:$0xf] %vm2042_vm1, %v2074_v9 }
 0x1c4   : > { %v2080_v55 = vld [vmem:[#allocation5] sm:$0xf] }
 0x1c5   : > { %v2081_v14 = vmul.f32 0.015625, %v2080_v55 }
 0x1c7   : > { %v2085_v12 = vsel %vm2084_vm2, 1.0, %v2081_v14 }
 0x1c8   : > { %2086 = vst.msk [vmem:[#allocation5] sm:$0xf] %vm2042_vm1, %v2085_v12 }
 0x1c9 PF: > { %p2282_p8 = scmp.eq.s32.totalorder %s2550_s10, 3  ;;  %s2520_s9 = smov [#allocation5]  }
 0x1ca   : > { %s2094_s15 = sshll.u32 %s2520_s9, 4  ;;  %s2095_s15 = int_to_ptr.vmem [resolvable:$true] %s2094_s15 }
 0x1cb   : > { %s2448_s20 = scalar_lea.vmem %s2095_s15, 64  ;;  %p2455_p10 = scmp.lt.s32.totalorder %s2095_s15, %s2095_s15 }
 0x1cc   : > { %p2449_p4 = scmp.ne.s32.totalorder %s2095_s15, %s2448_s20  ;;  %p2456_p12 = scmp.lt.s32.totalorder %s2448_s20, %s2448_s20 }
 0x1ce   : > { %p2450_p5 = pnand %p2449_p4, %p2282_p8  ;;  %p2457_p0 = por %p2456_p12, %p2455_p10 }
 0x1d0   : > { %p2451_p6 = pneg %p2450_p5 }
 0x1d2   : > { %p2458_p1 = pnand %p2457_p0, %p2451_p6 }
 0x1d4   : > { %2461 = shalt.err (!%p2458_p1)
}
 0x1d5   : > { %s2462_s23 = scalar_lea.hbm %s3083_s1, 64 }
 0x1d6   : > { %p2463_p2 = scmp.ne.s32.totalorder %s3083_s1, %s2462_s23  ;;  %p2468_p3 = scmp.lt.u32.totalorder %s2462_s23, %s3083_s1 }
 0x1d8   : > { %p2464_p11 = pnand %p2463_p2, %p2282_p8 }
 0x1da   : > { %p2465_p13 = pneg %p2464_p11 }
 0x1dc   : > { %p2470_p9 = pnand %p2468_p3, %p2465_p13 }
 0x1de   : > { %2473 = shalt.err (!%p2470_p9)
}
 0x1df   : > { %2274 = dma.vmem_to_hbm [thread:$0]  (%p2282_p8), %s2095_s15, 64, %s3083_s1, [#allocation4]  }
 0x1e0   : > { %2495 = dma.done.wait (%p2282_p8), [#allocation4], 64  }
 0x1e1   : > { %2497 = vsyncadd (%p2282_p8), [#allocation4], 4294967232 }
 0x1e2 PF: > { %p12_p7 = scmp.ge.s32.totalorder %s2553_s11, 6   ;;  %s3087_s6 = smov %s2504_s7 }
 0x1e3   : > { %s3088_s7 = smov %s2508_s8  ;;  %s3089_s8 = smov %s2563_s14 }
 0x1e4   : > { %s3090_s9 = smov %s2553_s11  ;;  %14 = sbr.rel (!%p12_p7) target bundleno = 4 (0x4), region = 69 }
 0x1eb   :  { %2107 = vsyncpa [#allocation3], 1 }
 0x1ec   :  { %2109 = vsyncpa [#allocation3 + $0x1], 1 }
 0x1ed   :  { %2110 = vsyncpa [#allocation4], 1 }
 0x1ee   :  { %2112 = vsyncpa [#allocation4 + $0x1], 1 }

</bundles_post_ra>
